<compile_context>
chip_gen: v5e
topology: v5e:2x2
jax: 0.10.0
libtpu: 0.0.40
codegen_flags: <defaults>
</compile_context>

<pallas_src>
import jax
import jax.numpy as jnp
from jax import lax
from jax.experimental import pallas as pl
from jax.experimental.pallas import tpu as pltpu


# ----------------------------- small helpers --------------------------------

def _round_up(x, m):
    return ((x + m - 1) // m) * m


def _cdiv(a, b):
    return (a + b - 1) // b


def _vmem_budget_bytes():
    """~75% of the per-core physical VMEM; conservative fallback if unknown."""
    try:
        cap = int(pltpu.get_tpu_info().vmem_capacity_bytes)
    except Exception:
        cap = 64 << 20        # v7x-sized fallback -> safe on every generation
    return max(16 << 20, int(cap * 0.75))


def _sublane_granule(dtype):
    # fp32 -> 8, bf16 -> 16, int8/fp8 -> 32 (packed sublane layouts).
    return max(8, 32 // jnp.dtype(dtype).itemsize)


def _balanced_tile(dim, max_tile, granule):
    """Largest tile <= max_tile splitting `dim` into near-equal granule-aligned
    pieces (avoids e.g. M=300 -> Mp=512 padding waste of a fixed 256 cap)."""
    max_tile = max(granule, (max_tile // granule) * granule)
    if dim <= max_tile:
        return _round_up(dim, granule)
    n = _cdiv(dim, max_tile)
    return _round_up(_cdiv(dim, n), granule)


# ------------------------------- kernels -------------------------------------

def _mol_fusion_kernel_fp32(a_ref, b_ref, o_ref):
    """fp32 path: accumulate directly into the k-resident output block."""
    k = pl.program_id(2)
    a = a_ref[...]
    b = b_ref[...]

    @pl.when(k == 0)
    def _init():
        o_ref[...] = a                       # residual A

    # s = A_tile @ B_tile^T  (contract last axes -> no transpose materialized)
    s = lax.dot_general(
        a, b,
        dimension_numbers=(((1,), (1,)), ((), ())),
        preferred_element_type=jnp.float32,
    )
    # Fused read-modify-write keeps the v7x MRB in-place accumulate path.
    o_ref[...] += jnp.dot(s, b, preferred_element_type=jnp.float32)


def _mol_fusion_kernel_acc(a_ref, b_ref, o_ref, acc_ref):
    """Low-precision path: fp32 scratch accumulator, cast at the last k-step."""
    k = pl.program_id(2)
    a = a_ref[...]
    b = b_ref[...]

    @pl.when(k == 0)
    def _init():
        acc_ref[...] = jnp.zeros_like(acc_ref)

    s = lax.dot_general(
        a, b,
        dimension_numbers=(((1,), (1,)), ((), ())),
        preferred_element_type=jnp.float32,
    )
    # NOTE: s is cast back to the input dtype (matches a low-precision torch
    # forward; keeps both MXU operands narrow -> full-rate MXU path).
    acc_ref[...] += jnp.dot(s.astype(b.dtype), b,
                            preferred_element_type=jnp.float32)

    @pl.when(k == pl.num_programs(2) - 1)
    def _fin():
        o_ref[...] = (acc_ref[...] + a.astype(jnp.float32)).astype(o_ref.dtype)


def _mol_fusion_kernel_batched(a_ref, b_ref, o_ref):
    """Small-M/N path: several batch elements per grid step (batched dots)."""
    a = a_ref[...]                            # (bb, Mp, Dp)
    b = b_ref[...]                            # (bb, Np, Dp)
    s = jnp.einsum("bmd,bnd->bmn", a, b, preferred_element_type=jnp.float32)
    if a.dtype != jnp.float32:
        s = s.astype(a.dtype)
    out = jnp.einsum("bmn,bnd->bmd", s, b, preferred_element_type=jnp.float32)
    o_ref[...] = (out + a.astype(jnp.float32)).astype(o_ref.dtype)


# ------------------------------- wrapper --------------------------------------

def mol_fusion(A, B, *, tile_max=256):
    """A: (batch, M, D), B: (batch, N, D) -> (A @ B^T) @ B + A."""
    batch, M, D = A.shape
    batch_b, N, D_b = B.shape
    assert batch == batch_b and D == D_b

    dtype = A.dtype
    dsize = jnp.dtype(dtype).itemsize
    granule = _sublane_granule(dtype)
    Dp = _round_up(D, 128)
    budget = _vmem_budget_bytes()
    is_fp32 = dtype == jnp.float32

    flops = 4 * batch * M * N * D

    Mp1 = _round_up(M, granule)
    Np1 = _round_up(N, granule)

    # ---------------- batched single-tile path (small M/N) ------------------
    def batched_footprint(bb):
        # A, out, B double-buffered + (Mp, Np) intermediate (+ its cast copy).
        return bb * (2 * (2 * Mp1 + Np1) * Dp * dsize
                     + Mp1 * Np1 * (4 + dsize))

    use_batched = (Mp1 <= 256 and Np1 <= 256
                   and batched_footprint(1) <= budget)

    if use_batched:
        # Keep >= 2 grid steps on the leading parallel axis when possible so
        # both v7x TensorCores get work.
        bb_cap = min(8, max(1, _cdiv(batch, 2)))
        bb = 1
        while bb * 2 <= bb_cap and batched_footprint(bb * 2) <= budget:
            bb *= 2
        batch_p = _round_up(batch, bb)

        A_p = A
        B_p = B
        if (batch_p, Mp1, Dp) != (batch, M, D):
            A_p = jnp.pad(A, ((0, batch_p - batch), (0, Mp1 - M), (0, Dp - D)))
        if (batch_p, Np1, Dp) != (batch, N, D):
            B_p = jnp.pad(B, ((0, batch_p - batch), (0, Np1 - N), (0, Dp - D)))

        vmem_limit = min(budget,
                         max(int(1.5 * batched_footprint(bb)), 16 << 20))
        cost = pl.CostEstimate(
            flops=flops,
            transcendentals=0,
            bytes_accessed=batch * (2 * M * D + N * D) * dsize,
        )

        out = pl.pallas_call(
            _mol_fusion_kernel_batched,
            out_shape=jax.ShapeDtypeStruct((batch_p, Mp1, Dp), dtype),
            grid_spec=pltpu.PrefetchScalarGridSpec(
                num_scalar_prefetch=0,
                grid=(batch_p // bb,),
                in_specs=[
                    pl.BlockSpec((bb, Mp1, Dp), lambda g: (g, 0, 0)),
                    pl.BlockSpec((bb, Np1, Dp), lambda g: (g, 0, 0)),
                ],
                out_specs=pl.BlockSpec((bb, Mp1, Dp), lambda g: (g, 0, 0)),
            ),
            compiler_params=pltpu.CompilerParams(
                dimension_semantics=("parallel",),
                vmem_limit_bytes=vmem_limit,
            ),
            cost_estimate=cost,
        )(A_p, B_p)

        if (batch_p, Mp1, Dp) != (batch, M, D):
            out = out[:batch, :M, :D]
        return out

    # ---------------- general tiled path (reduction over N tiles) -----------
    need_acc = not is_fp32

    def tiled_footprint(tm, tn, nbuf_b=2):
        return (2 * tm * Dp * dsize            # A tile (double-buffered)
                + nbuf_b * tn * Dp * dsize     # B tile
                + 2 * tm * Dp * dsize          # output tile
                + (tm * Dp * 4 if need_acc else 0)
                + tm * tn * (4 + dsize))       # s intermediate (+ cast copy)

    tm = _balanced_tile(M, tile_max, granule)
    tn = _balanced_tile(N, tile_max, granule)
    # Shrink tiles until the footprint fits the per-generation VMEM budget.
    while tiled_footprint(tm, tn) > budget and (tm > granule or tn > granule):
        if tn >= tm and tn > granule:
            tn = _balanced_tile(N, max(granule, tn // 2), granule)
        else:
            tm = _balanced_tile(M, max(granule, tm // 2), granule)

    Mp = tm * _cdiv(M, tm)
    Np = tn * _cdiv(N, tn)
    n_k = Np // tn

    # Zero padding is mathematically exact for (A @ B^T) @ B + A.
    A_p = A if (Mp, Dp) == (M, D) else jnp.pad(
        A, ((0, 0), (0, Mp - M), (0, Dp - D)))
    B_p = B if (Np, Dp) == (N, D) else jnp.pad(
        B, ((0, 0), (0, Np - N), (0, Dp - D)))

    # Deeper pipelining on B when per-step MXU work is small and the
    # reduction is long enough to benefit.
    b_spec_kwargs = {}
    if (Dp <= 256 and n_k >= 3 and hasattr(pl, "Buffered")
            and tiled_footprint(tm, tn, nbuf_b=3) <= budget):
        b_spec_kwargs["pipeline_mode"] = pl.Buffered(3)

    in_specs = [
        # A tile is invariant over the reduction axis -> stays resident.
        pl.BlockSpec((None, tm, Dp), lambda b, i, k: (b, i, 0)),
        pl.BlockSpec((None, tn, Dp), lambda b, i, k: (b, k, 0),
                     **b_spec_kwargs),
    ]
    out_spec = pl.BlockSpec((None, tm, Dp), lambda b, i, k: (b, i, 0))

    kernel = _mol_fusion_kernel_fp32 if is_fp32 else _mol_fusion_kernel_acc
    scratch = [] if is_fp32 else [pltpu.VMEM((tm, Dp), jnp.float32)]

    vmem_limit = min(budget, max(int(1.5 * tiled_footprint(tm, tn, 3)),
                                 16 << 20))
    cost = pl.CostEstimate(
        flops=flops,
        transcendentals=0,
        # B is re-streamed once per M-tile; A read once, out written once.
        bytes_accessed=batch * (2 * M * D + (Mp // tm) * N * D) * dsize,
    )

    out = pl.pallas_call(
        kernel,
        out_shape=jax.ShapeDtypeStruct((batch, Mp, Dp), dtype),
        grid_spec=pltpu.PrefetchScalarGridSpec(
            num_scalar_prefetch=0,
            grid=(batch, Mp // tm, n_k),
            in_specs=in_specs,
            out_specs=out_spec,
            scratch_shapes=scratch,
        ),
        compiler_params=pltpu.CompilerParams(
            dimension_semantics=("parallel", "parallel", "arbitrary"),
            vmem_limit_bytes=vmem_limit,
        ),
        cost_estimate=cost,
    )(A_p, B_p)

    if (Mp, Dp) != (M, D):
        out = out[:, :M, :D]
    return out


def mol_fusion_ref(A, B):
    """Pure-JAX reference mirroring the PyTorch forward."""
    r1 = jnp.einsum("bmd,bnd->bmn", A, B, precision=lax.Precision.HIGHEST)
    r2 = jnp.einsum("bmn,bnd->bmd", r1, B, precision=lax.Precision.HIGHEST)
    return r2 + A


if __name__ == "__main__":
    key = jax.random.PRNGKey(0)
    k_a, k_b, k_c, k_d = jax.random.split(key, 4)

    # Primary (module-sized) check: small shapes -> batched single-tile path.
    batch, M, N, D = 2, 8, 8, 32
    A = jax.random.normal(k_a, (batch, M, D), dtype=jnp.float32)
    B = jax.random.normal(k_b, (batch, N, D), dtype=jnp.float32)

    out = jax.block_until_ready(mol_fusion(A, B))
    ref = mol_fusion_ref(A, B)
    assert out.shape == (batch, M, D)
    assert jnp.allclose(out, ref, atol=1e-3, rtol=1e-3), "mismatch (batched path)"

    # Secondary check: forces the tiled reduction path (M, N > 256).
    A2 = jax.random.normal(k_c, (1, 264, 64), dtype=jnp.float32)
    B2 = jax.random.normal(k_d, (1, 264, 64), dtype=jnp.float32)
    out2 = jax.block_until_ready(mol_fusion(A2, B2))
    ref2 = mol_fusion_ref(A2, B2)
    assert out2.shape == A2.shape
    assert jnp.allclose(out2, ref2, atol=1e-2, rtol=1e-3), "mismatch (tiled path)"

    print("KERNEL_OK")
</pallas_src>

<mosaic_0001>
module attributes {stable_mosaic.version = 11 : i64} {
  func.func @_mol_fusion_kernel_batched(%arg0: i32, %arg1: memref<1x8x128xf32, #tpu.memory_space<vmem>>, %arg2: memref<1x8x128xf32, #tpu.memory_space<vmem>>, %arg3: memref<1x8x128xf32, #tpu.memory_space<vmem>>) attributes {dimension_semantics = [#tpu.dimension_semantics<parallel>], iteration_bounds = array<i64: 2>, scalar_prefetch = 0 : i64, scratch_operands = 0 : i64, tpu.core_type = #tpu.core_type<tc>, window_params = [{transform_indices = @transform_0, window_bounds = array<i64: 1, 8, 128>}, {transform_indices = @transform_1, window_bounds = array<i64: 1, 8, 128>}, {transform_indices = @transform_2, window_bounds = array<i64: 1, 8, 128>}]} {
    %c0 = arith.constant 0 : index
    %c0_0 = arith.constant 0 : index
    %c0_1 = arith.constant 0 : index
    %0 = vector.load %arg1[%c0, %c0_0, %c0_1] : memref<1x8x128xf32, #tpu.memory_space<vmem>>, vector<1x8x128xf32>
    %c0_2 = arith.constant 0 : index
    %c0_3 = arith.constant 0 : index
    %c0_4 = arith.constant 0 : index
    %1 = vector.load %arg2[%c0_2, %c0_3, %c0_4] : memref<1x8x128xf32, #tpu.memory_space<vmem>>, vector<1x8x128xf32>
    "tpu.trace_start"() <{level = 10 : i32, message = "bmd,bnd->bmn"}> : () -> ()
    %cst = arith.constant dense<0.000000e+00> : vector<1x8x8xf32>
    %2 = tpu.matmul %0, %1, %cst {dimension_numbers = #tpu.dot_dimension_numbers<[2], [2], [1], [1], [0, 0, 0, 1, 1, 1], [0], [0]>} : vector<1x8x128xf32>, vector<1x8x128xf32>, vector<1x8x8xf32> -> vector<1x8x8xf32>
    "tpu.trace_stop"() : () -> ()
    "tpu.trace_start"() <{level = 10 : i32, message = "bmn,bnd->bmd"}> : () -> ()
    %cst_5 = arith.constant dense<0.000000e+00> : vector<1x8x128xf32>
    %3 = tpu.matmul %2, %1, %cst_5 {dimension_numbers = #tpu.dot_dimension_numbers<[2], [1], [1], [2], [0, 0, 0, 1, 1, 2], [0], [0]>} : vector<1x8x8xf32>, vector<1x8x128xf32>, vector<1x8x128xf32> -> vector<1x8x128xf32>
    "tpu.trace_stop"() : () -> ()
    %4 = arith.addf %3, %0 : vector<1x8x128xf32>
    %c0_6 = arith.constant 0 : index
    %c0_7 = arith.constant 0 : index
    %c0_8 = arith.constant 0 : index
    %5 = vector.load %arg3[%c0_6, %c0_7, %c0_8] : memref<1x8x128xf32, #tpu.memory_space<vmem>>, vector<1x8x128xf32>
    tpu.vector_store %arg3[%c0_6, %c0_7, %c0_8], %4 {strides = array<i32>} : memref<1x8x128xf32, #tpu.memory_space<vmem>>, vector<1x8x128xf32>,
    return
  }
  func.func @transform_0(%arg0: i32) -> (i32, i32, i32) {
    %c0_i32 = arith.constant 0 : i32
    %c0_i32_0 = arith.constant 0 : i32
    %c0_i32_1 = arith.constant 0 : i32
    return %arg0, %c0_i32, %c0_i32_0 : i32, i32, i32
  }
  func.func @transform_1(%arg0: i32) -> (i32, i32, i32) {
    %c0_i32 = arith.constant 0 : i32
    %c0_i32_0 = arith.constant 0 : i32
    %c0_i32_1 = arith.constant 0 : i32
    return %arg0, %c0_i32, %c0_i32_0 : i32, i32, i32
  }
  func.func @transform_2(%arg0: i32) -> (i32, i32, i32) {
    %c0_i32 = arith.constant 0 : i32
    %c0_i32_0 = arith.constant 0 : i32
    %c0_i32_1 = arith.constant 0 : i32
    return %arg0, %c0_i32, %c0_i32_0 : i32, i32, i32
  }
}

</mosaic_0001>

<bundles_post_ra>
// kernel: tpu_custom_call.1
= control target key start
LH: loop header
LB: loop body
LE: loop exit
PB: predicated region body
PF: predicated region fallthrough
CT: control target
= control target key end

     0   :  { %7 = vsyncpa [#allocation3], 0  ;;  %s730_s0 = inlined_call_operand.hbm [shape: f32[2,8,128], index: 0, kind: input, shape index: {}]   ;;  %s731_s1 = inlined_call_operand.hbm [shape: f32[2,8,128], index: 1, kind: input, shape index: {}]   ;;  %s732_s2 = inlined_call_operand.hbm [shape: f32[2,8,128], index: 2, kind: output, shape index: {}]  }
   0x1   :  { %9 = vsyncpa [#allocation3 + $0x1], 0 }
   0x2   :  { %10 = vsyncpa [#allocation6], 0 }
   0x3   :  { %12 = vsyncpa [#allocation6 + $0x1], 0 }
   0x4   :  { %13 = vsyncpa [#allocation4], 0 }
   0x5   :  { %15 = vsyncpa [#allocation4 + $0x1], 0  ;;  %s570_s9 = smov 0   ;;  %s572_s10 = smov 0  }
   0x6   :  { %s574_s11 = smov 0   ;;  %s576_s12 = smov 0  }
   0x7 LB: > { %s591_s13 = sadd.s32 4294967295, %s553_s12   ;;  %s356_s14 = sadd.s32 4294967294, %s553_s12   ;;  %s553_s12 = sphi %s576_s12, %s743_s12   ;;  %s549_s11 = sphi %s574_s11, %s742_s11   ;;  %s545_s10 = sphi %s572_s10, %s741_s10   ;;  %s541_s9 = sphi %s570_s9, %s740_s9  }
   0x8   : > { %s595_s15 = sadd.s32 1, %s553_s12   ;;  %s28_s16 = sadd.s32 1, %s549_s11 }
   0x9   : > { %s25_s17 = ssub.s32 %s553_s12, %s595_s15  ;;  %p35_p0 = scmp.ne.s32.totalorder %s549_s11, %s545_s10 }
   0xa   : > { %p26_p1 = scmp.eq.s32.totalorder %s25_s17, 0  ;;  %p36_p2 = scmp.eq.s32.totalorder %s553_s12, 0 }
   0xb   : > { %p41_p3 = scmp.ne.s32.totalorder %s545_s10, %s541_s9  ;;  %p42_p4 = scmp.eq.s32.totalorder %s591_s13, 0 }
   0xc   : > { %s607_s18 = scalar_select %p26_p1, %s549_s11, %s28_s16  }
   0xd   : > { %p609_p5 = por %p36_p2, %p35_p0  ;;  %p613_p6 = por %p42_p4, %p41_p3 }
   0xe   : > { %p91_p7 = scmp.eq.s32.totalorder %s591_s13, 1  ;;  %p97_p8 = scmp.eq.s32.totalorder %s356_s14, 1 }
   0xf   : > { %p389_p10 = scmp.lt.s32.totalorder %s553_s12, 2  ;;  %s629_s23 = sand.u32 1, %s549_s11  }
  0x10   : > { %p620_p11 = por %p91_p7, %p35_p0  ;;  %p624_p12 = por %p97_p8, %p41_p3 }
  0x11   : > { %s360_s24 = sshll.u32 %s553_s12, 3  ;;  %s359_s25 = sshll.u32 %s629_s23, 3 }
  0x12   : > { %s125_s28 = scalar_lea.hbm %s730_s0, %s360_s24  ;;  %s121_s30 = scalar_lea.vmem [#allocation2], %s359_s25 }
  0x13   : > { %s127_s29 = sshll.u32 %s125_s28, 4  ;;  %s129_s3 = sshll.u32 %s121_s30, 4  ;;  %s128_s29 = int_to_ptr.hbm [resolvable:$true] %s127_s29  ;;  %s130_s3 = int_to_ptr.vmem [resolvable:$true] %s129_s3 }
  0x14   : > { %p638_p13 = pnand %p389_p10, %p609_p5  ;;  %p363_p0 = scmp.ge.s32.totalorder %s553_s12, 1 }
  0x15   : > { %p153_p1 = scmp.lt.s32.totalorder %s553_s12, 3  ;;  %s118_s5 = scalar_lea.sflag [#allocation3], %s629_s23 }
  0x16   : > { %s423_s6 = sshra.s32 %s128_s29, 4  ;;  %p427_p3 = pneg %p638_p13  ;;  %s424_s6 = int_to_ptr.hbm [resolvable:$true] %s423_s6 }
  0x17   : > { %s425_s7 = scalar_lea.hbm %s424_s6, 8  ;;  %s430_s16 = scalar_lea.hbm %s730_s0, 16 }
  0x18   : > { %p426_p2 = scmp.ne.s32.totalorder %s424_s6, %s425_s7  ;;  %p431_p5 = scmp.lt.s32.totalorder %s424_s6, %s730_s0 }
  0x19   : > { %p432_p8 = scmp.lt.s32.totalorder %s430_s16, %s425_s7 }
  0x1a   : > { %p428_p4 = pnand %p427_p3, %p426_p2 }
  0x1b   : > { %p433_p10 = por %p432_p8, %p431_p5 }
  0x1c   : > { %p429_p7 = pneg %p428_p4 }
  0x1e   : > { %p434_p9 = pnand %p433_p10, %p429_p7 }
  0x20   : > { %437 = shalt.err (!%p434_p9)
}
  0x21   : > { %381 = dma.hbm_to_vmem [thread:$0]  (!%p638_p13), %s128_s29, 128, %s130_s3, %s118_s5  }
  0x22   : > { %p662_p2 = pnand %p363_p0, %p153_p1  ;;  %s144_s30 = scalar_lea.hbm %s731_s1, %s360_s24 }
  0x23   : > { %s146_s6 = sshll.u32 %s144_s30, 4  ;;  %s140_s7 = scalar_lea.vmem [#allocation5], %s359_s25  ;;  %s147_s6 = int_to_ptr.hbm [resolvable:$true] %s146_s6 }
  0x24   : > { %s148_s8 = sshll.u32 %s140_s7, 4  ;;  %s137_s14 = scalar_lea.sflag [#allocation6], %s629_s23  ;;  %s149_s8 = int_to_ptr.vmem [resolvable:$true] %s148_s8 }
  0x25   : > { %s453_s16 = sshra.s32 %s147_s6, 4  ;;  %s460_s5 = scalar_lea.hbm %s731_s1, 16  ;;  %s454_s16 = int_to_ptr.hbm [resolvable:$true] %s453_s16 }
  0x26   : > { %s455_s17 = scalar_lea.hbm %s454_s16, 8  ;;  %p461_p4 = scmp.lt.s32.totalorder %s454_s16, %s731_s1 }
  0x27   : > { %p456_p9 = scmp.ne.s32.totalorder %s454_s16, %s455_s17  ;;  %p462_p7 = scmp.lt.s32.totalorder %s460_s5, %s455_s17 }
  0x29   : > { %p458_p0 = pnand %p456_p9, %p427_p3  ;;  %p463_p5 = por %p462_p7, %p461_p4 }
  0x2b   : > { %p459_p1 = pneg %p458_p0 }
  0x2d   : > { %p464_p8 = pnand %p463_p5, %p459_p1 }
  0x2f   : > { %467 = shalt.err (!%p464_p8)
}
  0x30   : > { %384 = dma.hbm_to_vmem [thread:$0]  (!%p638_p13), %s147_s6, 128, %s149_s8, %s137_s14  }
  0x31   : > { %157 = sbr.rel (%p662_p2) target bundleno = 318 (0x13e), region = 28  ;;  %s684_s23 = sand.u32 (!%p662_p2), 1, %s545_s10  }
  0x32   : > { %s364_s25 = sshll.u32 (!%p662_p2), %s684_s23, 3  ;;  %s160_s27 = scalar_lea.sflag (!%p662_p2), [#allocation3], %s684_s23 }
  0x33   : > { %s163_s28 = scalar_lea.vmem (!%p662_p2), [#allocation2], %s364_s25 }
  0x36   : > { %528 = dma.done.wait (%p613_p6), %s160_s27, 128  }
  0x37   : > { %530 = vsyncadd (%p613_p6), %s160_s27, 4294967168  ;;  %s170_s4 = scalar_lea.sflag [#allocation6], %s684_s23  ;;  %s173_s30 = scalar_lea.vmem [#allocation5], %s364_s25 }
  0x38   : > { %532 = dma.done.wait (%p613_p6), %s170_s4, 128  }
  0x39   : > { %534 = vsyncadd (%p613_p6), %s170_s4, 4294967168  ;;  %v201_v0 = vld [vmem:[%s173_s30] sm:$0xff]  ;;  %v200_v1 = vld [vmem:[%s163_s28] sm:$0xff]  ;;  %vm222_vm0 = vcmask 64512   ;;  %s369_s26 = sshll.u32 %s591_s13, 3  ;;  %s199_s14 = scalar_lea.vmem [#allocation7], %s364_s25 }
  0x3a   : > { %217 = vmatpush.xpose.msra.mxu0 %v201_v0  ;;  %241 = vmatpush.msra.mxu1 %v201_v0  ;;  %s258_s8 = scalar_lea.hbm %s732_s2, %s369_s26  ;;  %s260_s16 = sshll.u32 %s199_s14, 4  ;;  %s261_s16 = int_to_ptr.vmem [resolvable:$true] %s260_s16 }
  0x3b   : > { %s262_s20 = sshll.u32 %s258_s8, 4  ;;  %s248_s17 = scalar_lea.sflag [#allocation4], %s684_s23  ;;  %s263_s20 = int_to_ptr.hbm [resolvable:$true] %s262_s20 }
  0x3c   : > { %s497_s29 = sshra.s32 %s263_s20, 4  ;;  %s503_s19 = scalar_lea.hbm %s732_s2, 16  ;;  %s498_s29 = int_to_ptr.hbm [resolvable:$true] %s497_s29 }
  0x3d   : > { %218 = vmatmul.f32.vlgmr.msra.gmra.mxu0 %v200_v1  ;;  %s499_s3 = scalar_lea.hbm %s498_s29, 8  ;;  %p504_p10 = scmp.lt.s32.totalorder %s498_s29, %s732_s2 }
  0x3e   : > { %p500_p6 = scmp.ne.s32.totalorder %s498_s29, %s499_s3  ;;  %p505_p2 = scmp.lt.s32.totalorder %s503_s19, %s499_s3 }
  0x40   : > { %p501_p13 = pnand %p500_p6, %p620_p11  ;;  %p506_p9 = por %p505_p2, %p504_p10 }
  0x42   : > { %p502_p3 = pneg %p501_p13 }
  0x44   : > { %p507_p0 = pnand %p506_p9, %p502_p3 }
  0xba   : > { %v219_v2 = vpop.f32.mrf.mxu0 }
  0xbb   : > { %367 = vmatmul.msk.f32.vlgmr.msra.gmra.mxu1 %vm222_vm0, %v219_v2 }
 0x138   : > { %v243_v3 = vpop.f32.mrf.mxu1 }
 0x139   : > { %v244_v4 = vadd.f32 %v243_v3, %v200_v1 }
 0x13b   : > { %246 = vst [vmem:[%s199_s14] sm:$0xff] %v244_v4 }
 0x13c   : > { %510 = shalt.err (!%p507_p0)
}
 0x13d   : > { %376 = dma.vmem_to_hbm [thread:$0]  (%p620_p11), %s261_s16, 128, %s263_s20, %s248_s17  }
 0x13e PF: > { %s274_s23 = sand.u32 1, %s541_s9   ;;  %p739_p1 = scmp.ge.s32.totalorder %s553_s12, 2 }
 0x13f   : > { %s275_s27 = scalar_lea.sflag [#allocation4], %s274_s23 }
 0x140   : > { %p386_p4 = pnand %p739_p1, %p624_p12 }
 0x142   : > { %p387_p7 = pneg %p386_p4 }
 0x144   : > { %536 = dma.done.wait (%p387_p7), %s275_s27, 128  }
 0x145   : > { %538 = vsyncadd (%p387_p7), %s275_s27, 4294967168  ;;  %p18_p5 = scmp.ge.s32.totalorder %s595_s15, 4   ;;  %s740_s9 = smov %s545_s10 }
 0x146   : > { %s741_s10 = smov %s549_s11  ;;  %s742_s11 = smov %s607_s18 }
 0x147   : > { %s743_s12 = smov %s595_s15  ;;  %20 = sbr.rel (!%p18_p5) target bundleno = 7 (0x7), region = 86 }
 0x14c   :  { %281 = vsyncpa [#allocation3], 1 }
 0x14d   :  { %283 = vsyncpa [#allocation3 + $0x1], 1 }
 0x14e   :  { %284 = vsyncpa [#allocation6], 1 }
 0x14f   :  { %286 = vsyncpa [#allocation6 + $0x1], 1 }
 0x150   :  { %287 = vsyncpa [#allocation4], 1 }
 0x151   :  { %289 = vsyncpa [#allocation4 + $0x1], 1 }

</bundles_post_ra>
